<compile_context>
chip_gen: v6e
topology: v6e:2x2x1
jax: 0.10.0
libtpu: 0.0.40
codegen_flags: <defaults>
</compile_context>

<pallas_src>
import functools

import jax
import jax.numpy as jnp
from jax.experimental import pallas as pl
from jax.experimental.pallas import tpu as pltpu

LANE = 128        # vreg lane width
MAX_TILE_B = 512  # batch rows per grid step for large batches


def _round_up(x, m):
    return ((x + m - 1) // m) * m


def _pick_tile_b(B):
    """Static batch-tile selection (runs outside jit on concrete shapes)."""
    if B <= LANE:
        # Small-batch latency path: one tile, rows padded only to a sublane
        # multiple (block dims equal full array dims, so (8,128) rule is met).
        return _round_up(B, 8)
    if B <= 2 * MAX_TILE_B:
        # Split into (at least) two 128-aligned tiles -> both TCs on v7x.
        return max(LANE, _round_up(_round_up(B, 2) // 2, LANE))
    return MAX_TILE_B


def _layernorm(x, gamma, beta, eps=1e-5):
    mu = jnp.mean(x, axis=-1, keepdims=True)
    xc = x - mu
    var = jnp.mean(xc * xc, axis=-1, keepdims=True)
    return xc * jax.lax.rsqrt(var + eps) * gamma + beta


def actor_kernel(obs_ref,
                 w1_ref, p1_ref,        # p1 = [bias1; gamma1; beta1]  (3, fc1)
                 w2_ref, p2_ref,        # p2 = [bias2; gamma2; beta2]  (3, fc2)
                 w3t_ref, b3_ref,       # pi weights transposed (NA8, fc2), bias (NA8, 1)
                 out_ref):              # (NA8, tile_b) transposed output tile
    x = obs_ref[...].astype(jnp.float32)

    # fc1 -> LayerNorm -> ReLU
    h = jnp.dot(x, w1_ref[...], preferred_element_type=jnp.float32) + p1_ref[0:1, :]
    h = jnp.maximum(_layernorm(h, p1_ref[1:2, :], p1_ref[2:3, :]), 0.0)

    # fc2 -> LayerNorm -> ReLU
    h = jnp.dot(h, w2_ref[...], preferred_element_type=jnp.float32) + p2_ref[0:1, :]
    h = jnp.maximum(_layernorm(h, p2_ref[1:2, :], p2_ref[2:3, :]), 0.0)

    # pi -> tanh, computed transposed: (NA8, fc2) x (tile_b, fc2) -> (NA8, tile_b)
    y = jax.lax.dot_general(w3t_ref[...], h, (((1,), (1,)), ((), ())),
                            preferred_element_type=jnp.float32) + b3_ref[...]
    out_ref[...] = jnp.tanh(y).astype(out_ref.dtype)


@functools.partial(jax.jit, static_argnames=("tile_b",))
def _actor_forward_impl(obs, params, tile_b):
    B, obs_len = obs.shape
    fc1 = params["w1"].shape[1]
    fc2 = params["w2"].shape[1]
    n_actions = params["w3"].shape[1]

    # ---- wrapper-side layout plumbing (cheap XLA work, shrinks kernel DMAs) ----
    B_pad = _round_up(B, tile_b)
    if B_pad != B:
        obs_p = jnp.zeros((B_pad, obs_len), obs.dtype).at[:B].set(obs)
    else:
        obs_p = obs

    # Pack bias / gamma / beta of each LayerNorm layer into a single operand.
    p1 = jnp.concatenate([params["b1"], params["g1"], params["be1"]], axis=0)
    p2 = jnp.concatenate([params["b2"], params["g2"], params["be2"]], axis=0)

    # Transposed, sublane-padded pi weights: output tile is (NA8, tile_b).
    NA8 = _round_up(n_actions, 8)
    w3t = jnp.zeros((NA8, fc2), jnp.float32).at[:n_actions, :].set(params["w3"].T)
    b3 = jnp.zeros((NA8, 1), jnp.float32).at[:n_actions, 0].set(params["b3"][0])

    n_tiles = B_pad // tile_b

    out = pl.pallas_call(
        actor_kernel,
        grid=(n_tiles,),
        in_specs=[
            # batch rows: tiled along the grid
            pl.BlockSpec((tile_b, obs_len), lambda i: (i, 0)),
            # weights / packed params: constant index_map -> VMEM-resident
            pl.BlockSpec((obs_len, fc1), lambda i: (0, 0)),
            pl.BlockSpec((3, fc1), lambda i: (0, 0)),
            pl.BlockSpec((fc1, fc2), lambda i: (0, 0)),
            pl.BlockSpec((3, fc2), lambda i: (0, 0)),
            pl.BlockSpec((NA8, fc2), lambda i: (0, 0)),
            pl.BlockSpec((NA8, 1), lambda i: (0, 0)),
        ],
        # transposed output: lanes = batch rows (lane-dense for large tiles)
        out_specs=pl.BlockSpec((NA8, tile_b), lambda i: (0, i)),
        out_shape=jax.ShapeDtypeStruct((NA8, B_pad), jnp.float32),
        compiler_params=pltpu.CompilerParams(
            dimension_semantics=("parallel",)),  # shard batch tiles over v7x's 2 TCs
    )(obs_p, params["w1"], p1, params["w2"], p2, w3t, b3)

    # Tiny slice + transpose back to (B, n_actions).
    return out[:n_actions, :B].T


def actor_forward(obs, params):
    """obs: [B, obs_len] f32; params: dict of weights (see init_params)."""
    return _actor_forward_impl(obs, params, tile_b=_pick_tile_b(obs.shape[0]))


def init_params(key, obs_len, n_actions, fc1_dims=64, fc2_dims=64):
    """Deterministic synthetic init mirroring ActorNetwork.__init__ bounds."""
    k1w, k1b, k2w, k2b, k3w, k3b = jax.random.split(key, 6)
    # PyTorch: f1 = 1/sqrt(fc1.weight.size(0)) = 1/sqrt(fc1_dims)
    f1 = 1.0 / jnp.sqrt(jnp.float32(fc1_dims))
    f2 = 1.0 / jnp.sqrt(jnp.float32(fc2_dims))
    f3 = 0.003

    def u(k, shape, bound):
        return jax.random.uniform(k, shape, jnp.float32, -bound, bound)

    return {
        # stored as [in, out] (transpose of nn.Linear.weight)
        "w1": u(k1w, (obs_len, fc1_dims), f1),
        "b1": u(k1b, (1, fc1_dims), f1),
        "g1": jnp.ones((1, fc1_dims), jnp.float32),
        "be1": jnp.zeros((1, fc1_dims), jnp.float32),
        "w2": u(k2w, (fc1_dims, fc2_dims), f2),
        "b2": u(k2b, (1, fc2_dims), f2),
        "g2": jnp.ones((1, fc2_dims), jnp.float32),
        "be2": jnp.zeros((1, fc2_dims), jnp.float32),
        "w3": u(k3w, (fc2_dims, n_actions), f3),
        "b3": u(k3b, (1, n_actions), f3),
    }


def reference_forward(obs, p):
    """Pure-JAX reference for sanity checking."""
    def ln(x, g, b):
        mu = jnp.mean(x, -1, keepdims=True)
        var = jnp.mean((x - mu) ** 2, -1, keepdims=True)
        return (x - mu) / jnp.sqrt(var + 1e-5) * g + b

    h = jax.nn.relu(ln(obs @ p["w1"] + p["b1"], p["g1"], p["be1"]))
    h = jax.nn.relu(ln(h @ p["w2"] + p["b2"], p["g2"], p["be2"]))
    return jnp.tanh(h @ p["w3"] + p["b3"])


if __name__ == "__main__":
    key = jax.random.PRNGKey(0)
    k_obs, k_params, k_big = jax.random.split(key, 3)

    # Small MADDPG-like shapes.
    B, obs_len, n_actions = 2, 8, 4
    obs = jax.random.normal(k_obs, (B, obs_len), jnp.float32)
    params = init_params(k_params, obs_len, n_actions, fc1_dims=64, fc2_dims=64)

    out = jax.block_until_ready(actor_forward(obs, params))
    ref = reference_forward(obs, params)
    assert out.shape == (B, n_actions)
    assert jnp.allclose(out, ref, atol=1e-5, rtol=1e-5), "mismatch vs reference (B=2)"

    # Exercise the multi-tile grid (2 tiles, non-multiple-of-tile batch).
    B_big = 300
    obs_big = jax.random.normal(k_big, (B_big, obs_len), jnp.float32)
    out_big = jax.block_until_ready(actor_forward(obs_big, params))
    ref_big = reference_forward(obs_big, params)
    assert out_big.shape == (B_big, n_actions)
    assert jnp.allclose(out_big, ref_big, atol=1e-5, rtol=1e-5), "mismatch vs reference (B=300)"

    # Exercise the large-batch path (>2 tiles of 512, batch already tile-aligned).
    B_huge = 2048
    obs_huge = jax.random.normal(k_big, (B_huge, obs_len), jnp.float32)
    out_huge = jax.block_until_ready(actor_forward(obs_huge, params))
    ref_huge = reference_forward(obs_huge, params)
    assert out_huge.shape == (B_huge, n_actions)
    assert jnp.allclose(out_huge, ref_huge, atol=1e-5, rtol=1e-5), "mismatch vs reference (B=2048)"

    print("KERNEL_OK")
</pallas_src>

<mosaic_0001>
module attributes {stable_mosaic.version = 11 : i64} {
  func.func @actor_kernel(%arg0: i32, %arg1: memref<8x8xf32, #tpu.memory_space<vmem>>, %arg2: memref<8x64xf32, #tpu.memory_space<vmem>>, %arg3: memref<3x64xf32, #tpu.memory_space<vmem>>, %arg4: memref<64x64xf32, #tpu.memory_space<vmem>>, %arg5: memref<3x64xf32, #tpu.memory_space<vmem>>, %arg6: memref<8x64xf32, #tpu.memory_space<vmem>>, %arg7: memref<8x1xf32, #tpu.memory_space<vmem>>, %arg8: memref<8x8xf32, #tpu.memory_space<vmem>>) attributes {dimension_semantics = [#tpu.dimension_semantics<parallel>], iteration_bounds = array<i64: 1>, scalar_prefetch = 0 : i64, scratch_operands = 0 : i64, tpu.core_type = #tpu.core_type<tc>, window_params = [{transform_indices = @transform_0, window_bounds = array<i64: 8, 8>}, {pipeline_mode = #tpu.pipeline_mode<synchronous>, transform_indices = @transform_1, window_bounds = array<i64: 8, 64>}, {pipeline_mode = #tpu.pipeline_mode<synchronous>, transform_indices = @transform_2, window_bounds = array<i64: 3, 64>}, {pipeline_mode = #tpu.pipeline_mode<synchronous>, transform_indices = @transform_3, window_bounds = array<i64: 64, 64>}, {pipeline_mode = #tpu.pipeline_mode<synchronous>, transform_indices = @transform_4, window_bounds = array<i64: 3, 64>}, {pipeline_mode = #tpu.pipeline_mode<synchronous>, transform_indices = @transform_5, window_bounds = array<i64: 8, 64>}, {pipeline_mode = #tpu.pipeline_mode<synchronous>, transform_indices = @transform_6, window_bounds = array<i64: 8, 1>}, {transform_indices = @transform_7, window_bounds = array<i64: 8, 8>}]} {
    %c0 = arith.constant 0 : index
    %c0_0 = arith.constant 0 : index
    %0 = vector.load %arg1[%c0, %c0_0] : memref<8x8xf32, #tpu.memory_space<vmem>>, vector<8x8xf32>
    %c0_1 = arith.constant 0 : index
    %c0_2 = arith.constant 0 : index
    %1 = vector.load %arg2[%c0_1, %c0_2] : memref<8x64xf32, #tpu.memory_space<vmem>>, vector<8x64xf32>
    %cst = arith.constant dense<0.000000e+00> : vector<8x64xf32>
    %2 = tpu.matmul %0, %1, %cst {dimension_numbers = #tpu.dot_dimension_numbers<[1], [0], [0], [1], [0, 0, 1, 1], [], []>} : vector<8x8xf32>, vector<8x64xf32>, vector<8x64xf32> -> vector<8x64xf32>
    %c0_3 = arith.constant 0 : index
    %c0_4 = arith.constant 0 : index
    %3 = vector.load %arg3[%c0_3, %c0_4] : memref<3x64xf32, #tpu.memory_space<vmem>>, vector<1x64xf32>
    %4 = vector.broadcast %3 : vector<1x64xf32> to vector<8x64xf32>
    %5 = arith.addf %2, %4 : vector<8x64xf32>
    %c1 = arith.constant 1 : index
    %c0_5 = arith.constant 0 : index
    %6 = vector.load %arg3[%c1, %c0_5] : memref<3x64xf32, #tpu.memory_space<vmem>>, vector<1x64xf32>
    %c2 = arith.constant 2 : index
    %c0_6 = arith.constant 0 : index
    %7 = vector.load %arg3[%c2, %c0_6] : memref<3x64xf32, #tpu.memory_space<vmem>>, vector<1x64xf32>
    %cst_7 = arith.constant dense<0.000000e+00> : vector<8xf32>
    %8 = vector.multi_reduction <add>, %5, %cst_7 [1] : vector<8x64xf32> to vector<8xf32>
    %9 = vector.shape_cast %8 : vector<8xf32> to vector<8x1xf32>
    %cst_8 = arith.constant 6.400000e+01 : f32
    %10 = vector.broadcast %cst_8 : f32 to vector<8x1xf32>
    %11 = arith.divf %9, %10 : vector<8x1xf32>
    %12 = vector.broadcast %11 : vector<8x1xf32> to vector<8x64xf32>
    %13 = arith.subf %5, %12 : vector<8x64xf32>
    %14 = arith.mulf %13, %13 : vector<8x64xf32>
    %cst_9 = arith.constant dense<0.000000e+00> : vector<8xf32>
    %15 = vector.multi_reduction <add>, %14, %cst_9 [1] : vector<8x64xf32> to vector<8xf32>
    %16 = vector.shape_cast %15 : vector<8xf32> to vector<8x1xf32>
    %cst_10 = arith.constant 6.400000e+01 : f32
    %17 = vector.broadcast %cst_10 : f32 to vector<8x1xf32>
    %18 = arith.divf %16, %17 : vector<8x1xf32>
    %cst_11 = arith.constant 9.99999974E-6 : f32
    %19 = vector.broadcast %cst_11 : f32 to vector<8x1xf32>
    %20 = arith.addf %18, %19 : vector<8x1xf32>
    %21 = math.rsqrt %20 : vector<8x1xf32>
    %22 = vector.broadcast %21 : vector<8x1xf32> to vector<8x64xf32>
    %23 = arith.mulf %13, %22 : vector<8x64xf32>
    %24 = vector.broadcast %6 : vector<1x64xf32> to vector<8x64xf32>
    %25 = arith.mulf %23, %24 : vector<8x64xf32>
    %26 = vector.broadcast %7 : vector<1x64xf32> to vector<8x64xf32>
    %27 = arith.addf %25, %26 : vector<8x64xf32>
    %cst_12 = arith.constant 0.000000e+00 : f32
    %28 = vector.broadcast %cst_12 : f32 to vector<8x64xf32>
    %29 = arith.maximumf %27, %28 : vector<8x64xf32>
    %c0_13 = arith.constant 0 : index
    %c0_14 = arith.constant 0 : index
    %30 = vector.load %arg4[%c0_13, %c0_14] : memref<64x64xf32, #tpu.memory_space<vmem>>, vector<64x64xf32>
    %cst_15 = arith.constant dense<0.000000e+00> : vector<8x64xf32>
    %31 = tpu.matmul %29, %30, %cst_15 {dimension_numbers = #tpu.dot_dimension_numbers<[1], [0], [0], [1], [0, 0, 1, 1], [], []>} : vector<8x64xf32>, vector<64x64xf32>, vector<8x64xf32> -> vector<8x64xf32>
    %c0_16 = arith.constant 0 : index
    %c0_17 = arith.constant 0 : index
    %32 = vector.load %arg5[%c0_16, %c0_17] : memref<3x64xf32, #tpu.memory_space<vmem>>, vector<1x64xf32>
    %33 = vector.broadcast %32 : vector<1x64xf32> to vector<8x64xf32>
    %34 = arith.addf %31, %33 : vector<8x64xf32>
    %c1_18 = arith.constant 1 : index
    %c0_19 = arith.constant 0 : index
    %35 = vector.load %arg5[%c1_18, %c0_19] : memref<3x64xf32, #tpu.memory_space<vmem>>, vector<1x64xf32>
    %c2_20 = arith.constant 2 : index
    %c0_21 = arith.constant 0 : index
    %36 = vector.load %arg5[%c2_20, %c0_21] : memref<3x64xf32, #tpu.memory_space<vmem>>, vector<1x64xf32>
    %cst_22 = arith.constant dense<0.000000e+00> : vector<8xf32>
    %37 = vector.multi_reduction <add>, %34, %cst_22 [1] : vector<8x64xf32> to vector<8xf32>
    %38 = vector.shape_cast %37 : vector<8xf32> to vector<8x1xf32>
    %cst_23 = arith.constant 6.400000e+01 : f32
    %39 = vector.broadcast %cst_23 : f32 to vector<8x1xf32>
    %40 = arith.divf %38, %39 : vector<8x1xf32>
    %41 = vector.broadcast %40 : vector<8x1xf32> to vector<8x64xf32>
    %42 = arith.subf %34, %41 : vector<8x64xf32>
    %43 = arith.mulf %42, %42 : vector<8x64xf32>
    %cst_24 = arith.constant dense<0.000000e+00> : vector<8xf32>
    %44 = vector.multi_reduction <add>, %43, %cst_24 [1] : vector<8x64xf32> to vector<8xf32>
    %45 = vector.shape_cast %44 : vector<8xf32> to vector<8x1xf32>
    %cst_25 = arith.constant 6.400000e+01 : f32
    %46 = vector.broadcast %cst_25 : f32 to vector<8x1xf32>
    %47 = arith.divf %45, %46 : vector<8x1xf32>
    %cst_26 = arith.constant 9.99999974E-6 : f32
    %48 = vector.broadcast %cst_26 : f32 to vector<8x1xf32>
    %49 = arith.addf %47, %48 : vector<8x1xf32>
    %50 = math.rsqrt %49 : vector<8x1xf32>
    %51 = vector.broadcast %50 : vector<8x1xf32> to vector<8x64xf32>
    %52 = arith.mulf %42, %51 : vector<8x64xf32>
    %53 = vector.broadcast %35 : vector<1x64xf32> to vector<8x64xf32>
    %54 = arith.mulf %52, %53 : vector<8x64xf32>
    %55 = vector.broadcast %36 : vector<1x64xf32> to vector<8x64xf32>
    %56 = arith.addf %54, %55 : vector<8x64xf32>
    %cst_27 = arith.constant 0.000000e+00 : f32
    %57 = vector.broadcast %cst_27 : f32 to vector<8x64xf32>
    %58 = arith.maximumf %56, %57 : vector<8x64xf32>
    %c0_28 = arith.constant 0 : index
    %c0_29 = arith.constant 0 : index
    %59 = vector.load %arg6[%c0_28, %c0_29] : memref<8x64xf32, #tpu.memory_space<vmem>>, vector<8x64xf32>
    %cst_30 = arith.constant dense<0.000000e+00> : vector<8x8xf32>
    %60 = tpu.matmul %59, %58, %cst_30 {dimension_numbers = #tpu.dot_dimension_numbers<[1], [1], [0], [0], [0, 0, 1, 0], [], []>} : vector<8x64xf32>, vector<8x64xf32>, vector<8x8xf32> -> vector<8x8xf32>
    %c0_31 = arith.constant 0 : index
    %c0_32 = arith.constant 0 : index
    %61 = vector.load %arg7[%c0_31, %c0_32] : memref<8x1xf32, #tpu.memory_space<vmem>>, vector<8x1xf32>
    %62 = vector.broadcast %61 : vector<8x1xf32> to vector<8x8xf32>
    %63 = arith.addf %60, %62 : vector<8x8xf32>
    %64 = math.tanh %63 : vector<8x8xf32>
    %c0_33 = arith.constant 0 : index
    %c0_34 = arith.constant 0 : index
    %65 = vector.load %arg8[%c0_33, %c0_34] : memref<8x8xf32, #tpu.memory_space<vmem>>, vector<8x8xf32>
    tpu.vector_store %arg8[%c0_33, %c0_34], %64 {strides = array<i32>} : memref<8x8xf32, #tpu.memory_space<vmem>>, vector<8x8xf32>,
    return
  }
  func.func @transform_0(%arg0: i32) -> (i32, i32) {
    %c0_i32 = arith.constant 0 : i32
    %c0_i32_0 = arith.constant 0 : i32
    return %arg0, %c0_i32 : i32, i32
  }
  func.func @transform_1(%arg0: i32) -> (i32, i32) {
    %c0_i32 = arith.constant 0 : i32
    %c0_i32_0 = arith.constant 0 : i32
    %c0_i32_1 = arith.constant 0 : i32
    return %c0_i32, %c0_i32_0 : i32, i32
  }
  func.func @transform_2(%arg0: i32) -> (i32, i32) {
    %c0_i32 = arith.constant 0 : i32
    %c0_i32_0 = arith.constant 0 : i32
    %c0_i32_1 = arith.constant 0 : i32
    return %c0_i32, %c0_i32_0 : i32, i32
  }
  func.func @transform_3(%arg0: i32) -> (i32, i32) {
    %c0_i32 = arith.constant 0 : i32
    %c0_i32_0 = arith.constant 0 : i32
    %c0_i32_1 = arith.constant 0 : i32
    return %c0_i32, %c0_i32_0 : i32, i32
  }
  func.func @transform_4(%arg0: i32) -> (i32, i32) {
    %c0_i32 = arith.constant 0 : i32
    %c0_i32_0 = arith.constant 0 : i32
    %c0_i32_1 = arith.constant 0 : i32
    return %c0_i32, %c0_i32_0 : i32, i32
  }
  func.func @transform_5(%arg0: i32) -> (i32, i32) {
    %c0_i32 = arith.constant 0 : i32
    %c0_i32_0 = arith.constant 0 : i32
    %c0_i32_1 = arith.constant 0 : i32
    return %c0_i32, %c0_i32_0 : i32, i32
  }
  func.func @transform_6(%arg0: i32) -> (i32, i32) {
    %c0_i32 = arith.constant 0 : i32
    %c0_i32_0 = arith.constant 0 : i32
    %c0_i32_1 = arith.constant 0 : i32
    return %c0_i32, %c0_i32_0 : i32, i32
  }
  func.func @transform_7(%arg0: i32) -> (i32, i32) {
    %c0_i32 = arith.constant 0 : i32
    %c0_i32_0 = arith.constant 0 : i32
    return %c0_i32, %arg0 : i32, i32
  }
}

</mosaic_0001>

<bundles_post_ra>
// kernel: _actor_forward_impl.1
= control target key start
LH: loop header
LB: loop body
LE: loop exit
PB: predicated region body
PF: predicated region fallthrough
CT: control target
= control target key end

     0   :  { %vm33_vm0 = vcmask 64512   ;;  %v398_v0 = vmov 0.0   ;;  %vm399_vm1 = vmmov 0   ;;  %vm109_vm2 = vcmask 523264   ;;  %s507_s1 = inlined_call_operand.vmem [shape: f32[8,64], index: 1, kind: input, shape index: {}]   ;;  %s508_s0 = inlined_call_operand.vmem [shape: f32[8,8], index: 0, kind: input, shape index: {}]   ;;  %s509_s2 = inlined_call_operand.vmem [shape: f32[3,64], index: 2, kind: input, shape index: {}]   ;;  %s510_s3 = inlined_call_operand.vmem [shape: f32[64,64], index: 3, kind: input, shape index: {}]   ;;  %s511_s4 = inlined_call_operand.vmem [shape: f32[3,64], index: 4, kind: input, shape index: {}]   ;;  %s512_s6 = inlined_call_operand.vmem [shape: f32[8,1], index: 6, kind: input, shape index: {}]   ;;  %s513_s5 = inlined_call_operand.vmem [shape: f32[8,64], index: 5, kind: input, shape index: {}]   ;;  %s514_s7 = inlined_call_operand.vmem [shape: f32[8,8], index: 7, kind: output, shape index: {}]  }
   0x1   :  { %359 = vmatprep.subr.mxu0 %v398_v0  ;;  %v27_v1 = vld [vmem:[%s507_s1] sm:$0xff]  ;;  %361 = vmatprep.mubr.msk.f32.mxu0 %vm399_vm1, %v398_v0  ;;  %v142_v13 = vld [vmem:[%s510_s3 + $0x38] sm:$0xff]  ;;  %v141_v14 = vld [vmem:[%s510_s3 + $0x30] sm:$0xff]  ;;  %v400_v41 = vmov 0  }
   0x2   :  { %v26_v2 = vld [vmem:[%s508_s0] sm:$0xff]  ;;  %360 = vmatpush3.msra.mxu0 %v27_v1  ;;  %364 = vmatprep.subr.mxu1 %v398_v0  ;;  %v140_v15 = vld [vmem:[%s510_s3 + $0x28] sm:$0xff]  ;;  %v138_v17 = vld [vmem:[%s510_s3 + $0x18] sm:$0xff] }
   0x3   :  { %362 = vmatmul.mubr.msk.f32.vlgmr.msra.gmra.mxu0 %vm33_vm0, %v26_v2  ;;  %380 = vmatprep.mubr.msk.f32.mxu1 %vm399_vm1, %v398_v0  ;;  %v336_v3 = vld [vmem:[%s509_s2] ss:$0 sm:$0xff]  ;;  %v137_v18 = vld [vmem:[%s510_s3 + $0x10] sm:$0xff]  ;;  %v136_v19 = vld [vmem:[%s510_s3 + $0x8] sm:$0xff] }
   0x4   :  { %383 = vmatprep.subr.mxu0 %v398_v0  ;;  %385 = vmatprep.mubr.msk.f32.mxu0 %vm399_vm1, %v398_v0  ;;  %v139_v16 = vld [vmem:[%s510_s3 + $0x20] sm:$0xff] }
   0x5   :  { %365 = vmatpush3.msra.mxu1 %v142_v13  ;;  %v135_v20 = vld [vmem:[%s510_s3] sm:$0xff]  ;;  %391 = vset.pattern.permute.xlu0 %v400_v41 }
   0x6   :  { %366 = vmatprep.subr.mxu1 %v398_v0  ;;  %v338_v25 = vld [vmem:[%s509_s2 + $0x1] ss:$0 sm:$0xff]  ;;  %v339_v27 = vld [vmem:[%s509_s2 + $0x2] ss:$0 sm:$0xff]  ;;  %v340_v31 = vld [vmem:[%s511_s4] ss:$0 sm:$0xff] }
   0x7   :  { %367 = vmatpush3.msra.mxu1 %v141_v14  ;;  %v248_v42 = vld [vmem:[%s512_s6] sm:$0xff] }
   0x8   :  { %368 = vmatprep.subr.mxu1 %v398_v0  ;;  %v342_v47 = vld [vmem:[%s511_s4 + $0x1] ss:$0 sm:$0xff]  ;;  %v343_v49 = vld [vmem:[%s511_s4 + $0x2] ss:$0 sm:$0xff] }
   0x9   :  { %369 = vmatpush3.msra.mxu1 %v140_v15  ;;  %v247_v53 = vld [vmem:[%s513_s5] sm:$0xff] }
   0xa   :  { %370 = vmatprep.subr.mxu1 %v398_v0 }
   0xb   :  { %371 = vmatpush3.msra.mxu1 %v139_v16 }
   0xc   :  { %372 = vmatprep.subr.mxu1 %v398_v0 }
   0xd   :  { %373 = vmatpush3.msra.mxu1 %v138_v17 }
   0xe   :  { %374 = vmatprep.subr.mxu1 %v398_v0 }
   0xf   :  { %375 = vmatpush3.msra.mxu1 %v137_v18 }
  0x10   :  { %376 = vmatprep.subr.mxu1 %v398_v0 }
  0x11   :  { %377 = vmatpush3.msra.mxu1 %v136_v19 }
  0x12   :  { %378 = vmatprep.subr.mxu1 %v398_v0 }
  0x13   :  { %379 = vmatpush3.msra.mxu1 %v135_v20 }
  0xc3   :  { %v103_v4 = vpop.f32.mrf.mxu0 }
  0xc4   :  { %v104_v5 = vadd.f32 %v336_v3, %v103_v4 }
  0xc5   :  { %v363_v6 = vpop.f32.mrf.mxu0 }
  0xc6   :  { %v110_v7 = vsel %vm109_vm2, %v104_v5, 0.0 }
  0xc7   :  { %111 = vadd.xlane.f32.xlu0 %v110_v7 }
 0x150   :  { %v112_v8 = vpop.xlane.xlu0 %111 }
 0x151   :  { %v114_v9 = vmul.f32 0.015625, %v112_v8 }
 0x153   :  { %v115_v10 = vsub.f32 %v104_v5, %v114_v9 }
 0x155   :  { %v116_v11 = vmul.f32 %v115_v10, %v115_v10 }
 0x157   :  { %v117_v12 = vsel %vm109_vm2, %v116_v11, 0.0 }
 0x158   :  { %118 = vadd.xlane.f32.xlu0 %v117_v12 }
 0x16e   :  { %251 = vperm.xlu0 %391, %v248_v42  }
 0x1e1   :  { %v119_v21 = vpop.xlane.xlu0 %118 }
 0x1e2   :  { %v120_v22 = vmul.f32 0.015625, %v119_v21 }
 0x1e4   :  { %v121_v23 = vadd.f32 1e-05, %v120_v22 }
 0x1e6   :  { %392 = vrsqrt.f32 %v121_v23 }
 0x1e9   :  { %v252_v54 = vpop.permute.xlu0 %251 }
 0x1f3   :  { %v393_v24 = vpop.eup %392 }
 0x1f4   :  { %v123_v26 = vmul.f32 %v393_v24, %v115_v10 }
 0x1f6   :  { %v128_v28 = vmul.f32 %v338_v25, %v123_v26 }
 0x1f8   :  { %v133_v29 = vadd.f32 %v339_v27, %v128_v28 }
 0x1fa   :  { %v134_v30 = vmax.f32 %v133_v29, 0.0 }
 0x1fc   :  { %381 = vmatmul.mubr.msk.f32.vlgmr.msra.gmra.mxu1 %vm109_vm2, %v134_v30 }
 0x2bc   :  { %v217_v32 = vpop.f32.mrf.mxu1 }
 0x2bd   :  { %v218_v33 = vadd.f32 %v340_v31, %v217_v32 }
 0x2be   :  { %v382_v34 = vpop.f32.mrf.mxu1 }
 0x2bf   :  { %v223_v35 = vsel %vm109_vm2, %v218_v33, 0.0 }
 0x2c0   :  { %224 = vadd.xlane.f32.xlu1 %v223_v35 }
 0x349   :  { %v225_v36 = vpop.xlane.xlu1 %224 }
 0x34a   :  { %v226_v37 = vmul.f32 0.015625, %v225_v36 }
 0x34c   :  { %v227_v38 = vsub.f32 %v218_v33, %v226_v37 }
 0x34e   :  { %v228_v39 = vmul.f32 %v227_v38, %v227_v38 }
 0x350   :  { %v229_v40 = vsel %vm109_vm2, %v228_v39, 0.0 }
 0x351   :  { %230 = vadd.xlane.f32.xlu1 %v229_v40 }
 0x3da   :  { %v231_v43 = vpop.xlane.xlu1 %230 }
 0x3db   :  { %v232_v44 = vmul.f32 0.015625, %v231_v43 }
 0x3dd   :  { %v233_v45 = vadd.f32 1e-05, %v232_v44 }
 0x3df   :  { %394 = vrsqrt.f32 %v233_v45 }
 0x3ec   :  { %v395_v46 = vpop.eup %394 }
 0x3ed   :  { %v235_v48 = vmul.f32 %v395_v46, %v227_v38 }
 0x3ef   :  { %v240_v50 = vmul.f32 %v342_v47, %v235_v48 }
 0x3f1   :  { %v245_v51 = vadd.f32 %v343_v49, %v240_v50 }
 0x3f3   :  { %v246_v52 = vmax.f32 %v245_v51, 0.0 }
 0x3f5   :  { %384 = vmatpush3.xpose.msk.msra.mxu0 %vm109_vm2, %v246_v52 }
 0x3f8   :  { %386 = vmatmul.mubr.msk.f32.vlgmr.msra.gmra.mxu0 %vm109_vm2, %v247_v53 }
 0x4b8   :  { %v326_v55 = vpop.f32.mrf.mxu0 }
 0x4b9   :  { %v327_v56 = vadd.f32 %v326_v55, %v252_v54 }
 0x4ba   :  { %v387_v57 = vpop.f32.mrf.mxu0 }
 0x4bb   :  { %396 = vtanh.f32 %v327_v56 }
 0x4c8   :  { %v397_v58 = vpop.eup %396 }
 0x4c9   :  { %331 = vst.msk [vmem:[%s514_s7] sm:$0xff] %vm33_vm0, %v397_v58 }

</bundles_post_ra>
